<compile_context>
chip_gen: v6e
topology: v6e:2x2x1
jax: 0.10.0
libtpu: 0.0.40
codegen_flags: <defaults>
</compile_context>

<pallas_src>
import functools

import jax
import jax.numpy as jnp
from jax.experimental import pallas as pl
from jax.experimental.pallas import tpu as pltpu

_LN_EPS = 1e-5


def _round_up(n, m):
    return -(-n // m) * m


def _layernorm(h, gamma, beta, inv_n):
    """Row LayerNorm over the lane axis.

    `inv_n` is 1/H for the *unpadded* hidden dim. Padded lanes of `h` are exactly
    0 and the matching gamma/beta pad entries are 0, so padded lanes stay 0.
    One-pass variance (E[h^2] - mu^2) with a clamp to guard cancellation.
    """
    mu = jnp.sum(h, axis=-1, keepdims=True) * inv_n
    ms = jnp.sum(h * h, axis=-1, keepdims=True) * inv_n
    var = jnp.maximum(ms - mu * mu, 0.0)
    return (h - mu) * jax.lax.rsqrt(var + _LN_EPS) * gamma + beta


def _residual_block_kernel(x_ref, w1_ref, w2_ref, p_ref, o_ref, *, inv_n):
    # p_ref rows: 0=b1, 1=gamma1, 2=beta1, 3=b2, 4=gamma2, 5=beta2 (rows 6,7 pad).
    # Matmuls run in the weight dtype (bf16 weights => native bf16 MXU path);
    # accumulation is f32 via preferred_element_type.
    h = jnp.dot(x_ref[...].astype(w1_ref.dtype), w1_ref[...],
                preferred_element_type=jnp.float32)
    h = h + p_ref[0:1, :]
    h = _layernorm(h, p_ref[1:2, :], p_ref[2:3, :], inv_n)
    h = jnp.maximum(h, 0.0)

    h = jnp.dot(h.astype(w2_ref.dtype), w2_ref[...],
                preferred_element_type=jnp.float32)
    h = h + p_ref[3:4, :]
    h = _layernorm(h, p_ref[4:5, :], p_ref[5:6, :], inv_n)

    # Residual + ReLU. Re-read x from its VMEM block (cheap vld) instead of
    # keeping an f32 copy live across both matmuls / LayerNorms.
    # (Padded batch-tail rows may be garbage; rows are independent and the
    #  out-of-bounds store is masked, so they never contaminate valid rows.)
    o_ref[...] = jnp.maximum(x_ref[...].astype(jnp.float32) + h,
                             0.0).astype(o_ref.dtype)


def residual_block(x, params, *, tm=None):
    """Fused forward of the PyTorch ResidualBlock.  x: (B, H)."""
    B, H = x.shape
    w1, w2 = params["w1"], params["w2"]
    out_dtype = x.dtype

    # ---- lane-dense hidden dim: pad H to a multiple of 128 -----------------
    H_pad = max(128, _round_up(H, 128))
    if H_pad != H:
        # Callers should provide H as a multiple of 128 to avoid these copies.
        x_in = jnp.zeros((B, H_pad), x.dtype).at[:, :H].set(x)
        w1_in = jnp.zeros((H_pad, H_pad), w1.dtype).at[:H, :H].set(w1)
        w2_in = jnp.zeros((H_pad, H_pad), w2.dtype).at[:H, :H].set(w2)
    else:
        x_in, w1_in, w2_in = x, w1, w2

    # Pack the six 1-D params into a single resident (8, H_pad) f32 block.
    # Padded columns stay 0 (gamma pad = 0 keeps padded lanes at 0 through LN).
    packed = jnp.zeros((8, H_pad), jnp.float32)
    for r, name in enumerate(("b1", "g1", "be1", "b2", "g2", "be2")):
        packed = packed.at[r, :H].set(params[name].astype(jnp.float32))

    # ---- batch tiling -------------------------------------------------------
    if tm is None:
        # 128 keeps the MXU fed on all gens with half the f32 intermediate live
        # set of 256 (v5e vst pressure / v7x VMEM), and gives >=2 grid steps for
        # B >= 256 so both v7x TensorCores get work.
        tm = 128 if B >= 128 else max(8, _round_up(B, 8))

    if B < tm:
        b_run = tm  # single sublane-aligned tile; tiny wrapper pad
        x_run = jnp.zeros((tm, H_pad), x_in.dtype).at[:B, :].set(x_in)
    else:
        b_run = B   # ragged tail (if any) handled by Pallas boundary masking
        x_run = x_in
    grid = (pl.cdiv(b_run, tm),)

    # ---- explicit VMEM budget ----------------------------------------------
    w_item = jnp.dtype(w1.dtype).itemsize
    x_item = jnp.dtype(x.dtype).itemsize
    o_item = jnp.dtype(out_dtype).itemsize
    resident_bytes = 2 * H_pad * H_pad * w_item + 8 * H_pad * 4   # single-buffered
    stream_bytes = 2 * tm * H_pad * (x_item + o_item)             # dbl-buffered x/out
    scratch_bytes = 5 * tm * H_pad * 4                            # f32 intermediates
    need = resident_bytes + stream_bytes + scratch_bytes
    vmem_limit = int(min(128 << 20, max(32 << 20, need + need // 4 + (2 << 20))))
    # TODO(synk): when 2*H_pad^2*itemsize exceeds ~40-48 MiB (v7x's 64 MiB VMEM),
    # stream w1/w2 over a trailing "arbitrary" K grid axis with f32 accumulators
    # instead of keeping both weights fully resident.

    cost = pl.CostEstimate(
        flops=4 * b_run * H_pad * H_pad,          # two (tm,H)x(H,H) matmuls
        transcendentals=2 * b_run,                # one rsqrt per row per LN
        bytes_accessed=2 * H_pad * H_pad * w_item + 2 * b_run * H_pad * x_item,
    )

    kernel = functools.partial(_residual_block_kernel, inv_n=1.0 / H)

    def _build(single_buffer_resident):
        if single_buffer_resident:
            resident = lambda shape: pl.BlockSpec(
                shape, lambda i: (0, 0), pipeline_mode=pl.Buffered(1))
        else:
            resident = lambda shape: pl.BlockSpec(shape, lambda i: (0, 0))
        in_specs = [
            pl.BlockSpec((tm, H_pad), lambda i: (i, 0)),   # x: streamed / pipelined
            resident((H_pad, H_pad)),                      # w1 (VMEM-resident)
            resident((H_pad, H_pad)),                      # w2 (VMEM-resident)
            resident((8, H_pad)),                          # packed b/gamma/beta
        ]
        out_spec = pl.BlockSpec((tm, H_pad), lambda i: (i, 0))
        return pl.pallas_call(
            kernel,
            out_shape=jax.ShapeDtypeStruct((b_run, H_pad), out_dtype),
            grid=grid,
            in_specs=in_specs,
            out_specs=out_spec,
            compiler_params=pltpu.CompilerParams(
                dimension_semantics=("parallel",),         # megacore-shard batch
                vmem_limit_bytes=vmem_limit,
            ),
            cost_estimate=cost,
        )

    try:
        out = _build(True)(x_run, w1_in, w2_in, packed)
    except Exception:
        # Fallback if pipeline_mode=pl.Buffered(1) is unsupported on this jax.
        out = _build(False)(x_run, w1_in, w2_in, packed)

    if b_run != B:
        out = out[:B]
    if H_pad != H:
        out = out[:, :H]
    return out


def init_params(key, hidden_dim, dtype=jnp.float32):
    """PyTorch-default init: Linear U(-1/sqrt(in), 1/sqrt(in)); LN gamma=1, beta=0.
    Weights stored as (in, out) == torch weight.T; use dtype=jnp.bfloat16 for the
    fast MXU path (LN params / biases stay f32)."""
    k1, k2, k3, k4 = jax.random.split(key, 4)
    bound = 1.0 / jnp.sqrt(hidden_dim)
    w1 = jax.random.uniform(k1, (hidden_dim, hidden_dim), jnp.float32, -bound, bound)
    b1 = jax.random.uniform(k2, (hidden_dim,), jnp.float32, -bound, bound)
    w2 = jax.random.uniform(k3, (hidden_dim, hidden_dim), jnp.float32, -bound, bound)
    b2 = jax.random.uniform(k4, (hidden_dim,), jnp.float32, -bound, bound)
    return {
        "w1": w1.astype(dtype), "b1": b1,
        "g1": jnp.ones((hidden_dim,), jnp.float32),
        "be1": jnp.zeros((hidden_dim,), jnp.float32),
        "w2": w2.astype(dtype), "b2": b2,
        "g2": jnp.ones((hidden_dim,), jnp.float32),
        "be2": jnp.zeros((hidden_dim,), jnp.float32),
    }


def residual_block_ref(x, p):
    """Pure-JAX (f32) reference of the PyTorch forward."""
    def ln(h, g, b, eps=_LN_EPS):
        mu = jnp.mean(h, axis=-1, keepdims=True)
        var = jnp.mean((h - mu) ** 2, axis=-1, keepdims=True)
        return (h - mu) / jnp.sqrt(var + eps) * g + b
    xf = x.astype(jnp.float32)
    h = xf @ p["w1"].astype(jnp.float32) + p["b1"]
    h = ln(h, p["g1"], p["be1"])
    h = jnp.maximum(h, 0.0)
    h = h @ p["w2"].astype(jnp.float32) + p["b2"]
    h = ln(h, p["g2"], p["be2"])
    return jnp.maximum(xf + h, 0.0)


if __name__ == "__main__":
    key = jax.random.PRNGKey(0)
    k_x, k_p = jax.random.split(key)
    batch, hidden_dim = 8, 32

    # 1) f32 weights — tight tolerance vs the pure-JAX reference.
    x = jax.random.normal(k_x, (batch, hidden_dim), dtype=jnp.float32)
    params = init_params(k_p, hidden_dim, dtype=jnp.float32)
    out = jax.block_until_ready(residual_block(x, params))
    ref = residual_block_ref(x, params)
    assert out.shape == (batch, hidden_dim)
    err32 = jnp.max(jnp.abs(out - ref))
    assert jnp.allclose(out, ref, atol=2e-5, rtol=2e-5), f"f32 max err {err32}"

    # 2) bf16 weights / bf16 activations (fast MXU path) — loose tolerance.
    params_bf16 = init_params(k_p, hidden_dim, dtype=jnp.bfloat16)
    x_bf16 = x.astype(jnp.bfloat16)
    out_bf16 = jax.block_until_ready(residual_block(x_bf16, params_bf16))
    ref_bf16 = residual_block_ref(x_bf16, params_bf16)
    assert out_bf16.shape == (batch, hidden_dim)
    err16 = jnp.max(jnp.abs(out_bf16.astype(jnp.float32) - ref_bf16))
    assert err16 < 1e-1, f"bf16 max err {err16}"

    print("KERNEL_OK")
</pallas_src>

<mosaic_0001>
module attributes {stable_mosaic.version = 11 : i64} {
  func.func @_residual_block_kernel(%arg0: i32, %arg1: memref<8x128xf32, #tpu.memory_space<vmem>>, %arg2: memref<128x128xf32, #tpu.memory_space<vmem>>, %arg3: memref<128x128xf32, #tpu.memory_space<vmem>>, %arg4: memref<8x128xf32, #tpu.memory_space<vmem>>, %arg5: memref<8x128xf32, #tpu.memory_space<vmem>>) attributes {dimension_semantics = [#tpu.dimension_semantics<parallel>], iteration_bounds = array<i64: 1>, scalar_prefetch = 0 : i64, scratch_operands = 0 : i64, tpu.core_type = #tpu.core_type<tc>, window_params = [{transform_indices = @transform_0, window_bounds = array<i64: 8, 128>}, {pipeline_mode = #tpu.pipeline_mode<synchronous>, transform_indices = @transform_1, window_bounds = array<i64: 128, 128>}, {pipeline_mode = #tpu.pipeline_mode<synchronous>, transform_indices = @transform_2, window_bounds = array<i64: 128, 128>}, {pipeline_mode = #tpu.pipeline_mode<synchronous>, transform_indices = @transform_3, window_bounds = array<i64: 8, 128>}, {transform_indices = @transform_4, window_bounds = array<i64: 8, 128>}]} {
    %c0 = arith.constant 0 : index
    %c0_0 = arith.constant 0 : index
    %0 = vector.load %arg1[%c0, %c0_0] : memref<8x128xf32, #tpu.memory_space<vmem>>, vector<8x128xf32>
    %c0_1 = arith.constant 0 : index
    %c0_2 = arith.constant 0 : index
    %1 = vector.load %arg2[%c0_1, %c0_2] : memref<128x128xf32, #tpu.memory_space<vmem>>, vector<128x128xf32>
    %cst = arith.constant dense<0.000000e+00> : vector<8x128xf32>
    %2 = tpu.matmul %0, %1, %cst {dimension_numbers = #tpu.dot_dimension_numbers<[1], [0], [0], [1], [0, 0, 1, 1], [], []>} : vector<8x128xf32>, vector<128x128xf32>, vector<8x128xf32> -> vector<8x128xf32>
    %c0_3 = arith.constant 0 : index
    %c0_4 = arith.constant 0 : index
    %3 = vector.load %arg4[%c0_3, %c0_4] : memref<8x128xf32, #tpu.memory_space<vmem>>, vector<1x128xf32>
    %4 = vector.broadcast %3 : vector<1x128xf32> to vector<8x128xf32>
    %5 = arith.addf %2, %4 : vector<8x128xf32>
    %c1 = arith.constant 1 : index
    %c0_5 = arith.constant 0 : index
    %6 = vector.load %arg4[%c1, %c0_5] : memref<8x128xf32, #tpu.memory_space<vmem>>, vector<1x128xf32>
    %c2 = arith.constant 2 : index
    %c0_6 = arith.constant 0 : index
    %7 = vector.load %arg4[%c2, %c0_6] : memref<8x128xf32, #tpu.memory_space<vmem>>, vector<1x128xf32>
    %cst_7 = arith.constant dense<0.000000e+00> : vector<8xf32>
    %8 = vector.multi_reduction <add>, %5, %cst_7 [1] : vector<8x128xf32> to vector<8xf32>
    %9 = vector.shape_cast %8 : vector<8xf32> to vector<8x1xf32>
    %cst_8 = arith.constant 3.125000e-02 : f32
    %10 = vector.broadcast %cst_8 : f32 to vector<8x1xf32>
    %11 = arith.mulf %9, %10 : vector<8x1xf32>
    %12 = arith.mulf %5, %5 : vector<8x128xf32>
    %cst_9 = arith.constant dense<0.000000e+00> : vector<8xf32>
    %13 = vector.multi_reduction <add>, %12, %cst_9 [1] : vector<8x128xf32> to vector<8xf32>
    %14 = vector.shape_cast %13 : vector<8xf32> to vector<8x1xf32>
    %cst_10 = arith.constant 3.125000e-02 : f32
    %15 = vector.broadcast %cst_10 : f32 to vector<8x1xf32>
    %16 = arith.mulf %14, %15 : vector<8x1xf32>
    %17 = arith.mulf %11, %11 : vector<8x1xf32>
    %18 = arith.subf %16, %17 : vector<8x1xf32>
    %cst_11 = arith.constant 0.000000e+00 : f32
    %19 = vector.broadcast %cst_11 : f32 to vector<8x1xf32>
    %20 = arith.maximumf %18, %19 : vector<8x1xf32>
    %21 = vector.broadcast %11 : vector<8x1xf32> to vector<8x128xf32>
    %22 = arith.subf %5, %21 : vector<8x128xf32>
    %cst_12 = arith.constant 9.99999974E-6 : f32
    %23 = vector.broadcast %cst_12 : f32 to vector<8x1xf32>
    %24 = arith.addf %20, %23 : vector<8x1xf32>
    %25 = math.rsqrt %24 : vector<8x1xf32>
    %26 = vector.broadcast %25 : vector<8x1xf32> to vector<8x128xf32>
    %27 = arith.mulf %22, %26 : vector<8x128xf32>
    %28 = vector.broadcast %6 : vector<1x128xf32> to vector<8x128xf32>
    %29 = arith.mulf %27, %28 : vector<8x128xf32>
    %30 = vector.broadcast %7 : vector<1x128xf32> to vector<8x128xf32>
    %31 = arith.addf %29, %30 : vector<8x128xf32>
    %cst_13 = arith.constant 0.000000e+00 : f32
    %32 = vector.broadcast %cst_13 : f32 to vector<8x128xf32>
    %33 = arith.maximumf %31, %32 : vector<8x128xf32>
    %c0_14 = arith.constant 0 : index
    %c0_15 = arith.constant 0 : index
    %34 = vector.load %arg3[%c0_14, %c0_15] : memref<128x128xf32, #tpu.memory_space<vmem>>, vector<128x128xf32>
    %cst_16 = arith.constant dense<0.000000e+00> : vector<8x128xf32>
    %35 = tpu.matmul %33, %34, %cst_16 {dimension_numbers = #tpu.dot_dimension_numbers<[1], [0], [0], [1], [0, 0, 1, 1], [], []>} : vector<8x128xf32>, vector<128x128xf32>, vector<8x128xf32> -> vector<8x128xf32>
    %c3 = arith.constant 3 : index
    %c0_17 = arith.constant 0 : index
    %36 = vector.load %arg4[%c3, %c0_17] : memref<8x128xf32, #tpu.memory_space<vmem>>, vector<1x128xf32>
    %37 = vector.broadcast %36 : vector<1x128xf32> to vector<8x128xf32>
    %38 = arith.addf %35, %37 : vector<8x128xf32>
    %c4 = arith.constant 4 : index
    %c0_18 = arith.constant 0 : index
    %39 = vector.load %arg4[%c4, %c0_18] : memref<8x128xf32, #tpu.memory_space<vmem>>, vector<1x128xf32>
    %c5 = arith.constant 5 : index
    %c0_19 = arith.constant 0 : index
    %40 = vector.load %arg4[%c5, %c0_19] : memref<8x128xf32, #tpu.memory_space<vmem>>, vector<1x128xf32>
    %cst_20 = arith.constant dense<0.000000e+00> : vector<8xf32>
    %41 = vector.multi_reduction <add>, %38, %cst_20 [1] : vector<8x128xf32> to vector<8xf32>
    %42 = vector.shape_cast %41 : vector<8xf32> to vector<8x1xf32>
    %cst_21 = arith.constant 3.125000e-02 : f32
    %43 = vector.broadcast %cst_21 : f32 to vector<8x1xf32>
    %44 = arith.mulf %42, %43 : vector<8x1xf32>
    %45 = arith.mulf %38, %38 : vector<8x128xf32>
    %cst_22 = arith.constant dense<0.000000e+00> : vector<8xf32>
    %46 = vector.multi_reduction <add>, %45, %cst_22 [1] : vector<8x128xf32> to vector<8xf32>
    %47 = vector.shape_cast %46 : vector<8xf32> to vector<8x1xf32>
    %cst_23 = arith.constant 3.125000e-02 : f32
    %48 = vector.broadcast %cst_23 : f32 to vector<8x1xf32>
    %49 = arith.mulf %47, %48 : vector<8x1xf32>
    %50 = arith.mulf %44, %44 : vector<8x1xf32>
    %51 = arith.subf %49, %50 : vector<8x1xf32>
    %cst_24 = arith.constant 0.000000e+00 : f32
    %52 = vector.broadcast %cst_24 : f32 to vector<8x1xf32>
    %53 = arith.maximumf %51, %52 : vector<8x1xf32>
    %54 = vector.broadcast %44 : vector<8x1xf32> to vector<8x128xf32>
    %55 = arith.subf %38, %54 : vector<8x128xf32>
    %cst_25 = arith.constant 9.99999974E-6 : f32
    %56 = vector.broadcast %cst_25 : f32 to vector<8x1xf32>
    %57 = arith.addf %53, %56 : vector<8x1xf32>
    %58 = math.rsqrt %57 : vector<8x1xf32>
    %59 = vector.broadcast %58 : vector<8x1xf32> to vector<8x128xf32>
    %60 = arith.mulf %55, %59 : vector<8x128xf32>
    %61 = vector.broadcast %39 : vector<1x128xf32> to vector<8x128xf32>
    %62 = arith.mulf %60, %61 : vector<8x128xf32>
    %63 = vector.broadcast %40 : vector<1x128xf32> to vector<8x128xf32>
    %64 = arith.addf %62, %63 : vector<8x128xf32>
    %c0_26 = arith.constant 0 : index
    %c0_27 = arith.constant 0 : index
    %65 = vector.load %arg1[%c0_26, %c0_27] : memref<8x128xf32, #tpu.memory_space<vmem>>, vector<8x128xf32>
    %66 = arith.addf %65, %64 : vector<8x128xf32>
    %cst_28 = arith.constant 0.000000e+00 : f32
    %67 = vector.broadcast %cst_28 : f32 to vector<8x128xf32>
    %68 = arith.maximumf %66, %67 : vector<8x128xf32>
    %c0_29 = arith.constant 0 : index
    %c0_30 = arith.constant 0 : index
    %69 = vector.load %arg5[%c0_29, %c0_30] : memref<8x128xf32, #tpu.memory_space<vmem>>, vector<8x128xf32>
    tpu.vector_store %arg5[%c0_29, %c0_30], %68 {strides = array<i32>} : memref<8x128xf32, #tpu.memory_space<vmem>>, vector<8x128xf32>,
    return
  }
  func.func @transform_0(%arg0: i32) -> (i32, i32) {
    %c0_i32 = arith.constant 0 : i32
    %c0_i32_0 = arith.constant 0 : i32
    return %arg0, %c0_i32 : i32, i32
  }
  func.func @transform_1(%arg0: i32) -> (i32, i32) {
    %c0_i32 = arith.constant 0 : i32
    %c0_i32_0 = arith.constant 0 : i32
    %c0_i32_1 = arith.constant 0 : i32
    return %c0_i32, %c0_i32_0 : i32, i32
  }
  func.func @transform_2(%arg0: i32) -> (i32, i32) {
    %c0_i32 = arith.constant 0 : i32
    %c0_i32_0 = arith.constant 0 : i32
    %c0_i32_1 = arith.constant 0 : i32
    return %c0_i32, %c0_i32_0 : i32, i32
  }
  func.func @transform_3(%arg0: i32) -> (i32, i32) {
    %c0_i32 = arith.constant 0 : i32
    %c0_i32_0 = arith.constant 0 : i32
    %c0_i32_1 = arith.constant 0 : i32
    return %c0_i32, %c0_i32_0 : i32, i32
  }
  func.func @transform_4(%arg0: i32) -> (i32, i32) {
    %c0_i32 = arith.constant 0 : i32
    %c0_i32_0 = arith.constant 0 : i32
    return %arg0, %c0_i32 : i32, i32
  }
}

module attributes {stable_mosaic.version = 11 : i64} {
  func.func @_residual_block_kernel(%arg0: i32, %arg1: memref<8x128xf32, #tpu.memory_space<vmem>>, %arg2: memref<128x128xf32, #tpu.memory_space<vmem>>, %arg3: memref<128x128xf32, #tpu.memory_space<vmem>>, %arg4: memref<8x128xf32, #tpu.memory_space<vmem>>, %arg5: memref<8x128xf32, #tpu.memory_space<vmem>>) attributes {dimension_semantics = [#tpu.dimension_semantics<parallel>], iteration_bounds = array<i64: 1>, scalar_prefetch = 0 : i64, scratch_operands = 0 : i64, tpu.core_type = #tpu.core_type<tc>, window_params = [{transform_indices = @transform_0, window_bounds = array<i64: 8, 128>}, {pipeline_mode = #tpu.pipeline_mode<synchronous>, transform_indices = @transform_1, window_bounds = array<i64: 128, 128>}, {pipeline_mode = #tpu.pipeline_mode<synchronous>, transform_indices = @transform_2, window_bounds = array<i64: 128, 128>}, {pipeline_mode = #tpu.pipeline_mode<synchronous>, transform_indices = @transform_3, window_bounds = array<i64: 8, 128>}, {transform_indices = @transform_4, window_bounds = array<i64: 8, 128>}]} {
    %c0 = arith.constant 0 : index
    %c0_0 = arith.constant 0 : index
    %0 = vector.load %arg1[%c0, %c0_0] : memref<8x128xf32, #tpu.memory_space<vmem>>, vector<8x128xf32>
    %c0_1 = arith.constant 0 : index
    %c0_2 = arith.constant 0 : index
    %1 = vector.load %arg2[%c0_1, %c0_2] : memref<128x128xf32, #tpu.memory_space<vmem>>, vector<128x128xf32>
    %cst = arith.constant dense<0.000000e+00> : vector<8x128xf32>
    %2 = tpu.matmul %0, %1, %cst {dimension_numbers = #tpu.dot_dimension_numbers<[1], [0], [0], [1], [0, 0, 1, 1], [], []>} : vector<8x128xf32>, vector<128x128xf32>, vector<8x128xf32> -> vector<8x128xf32>
    %c0_3 = arith.constant 0 : index
    %c0_4 = arith.constant 0 : index
    %3 = vector.load %arg4[%c0_3, %c0_4] : memref<8x128xf32, #tpu.memory_space<vmem>>, vector<1x128xf32>
    %4 = vector.broadcast %3 : vector<1x128xf32> to vector<8x128xf32>
    %5 = arith.addf %2, %4 : vector<8x128xf32>
    %c1 = arith.constant 1 : index
    %c0_5 = arith.constant 0 : index
    %6 = vector.load %arg4[%c1, %c0_5] : memref<8x128xf32, #tpu.memory_space<vmem>>, vector<1x128xf32>
    %c2 = arith.constant 2 : index
    %c0_6 = arith.constant 0 : index
    %7 = vector.load %arg4[%c2, %c0_6] : memref<8x128xf32, #tpu.memory_space<vmem>>, vector<1x128xf32>
    %cst_7 = arith.constant dense<0.000000e+00> : vector<8xf32>
    %8 = vector.multi_reduction <add>, %5, %cst_7 [1] : vector<8x128xf32> to vector<8xf32>
    %9 = vector.shape_cast %8 : vector<8xf32> to vector<8x1xf32>
    %cst_8 = arith.constant 3.125000e-02 : f32
    %10 = vector.broadcast %cst_8 : f32 to vector<8x1xf32>
    %11 = arith.mulf %9, %10 : vector<8x1xf32>
    %12 = arith.mulf %5, %5 : vector<8x128xf32>
    %cst_9 = arith.constant dense<0.000000e+00> : vector<8xf32>
    %13 = vector.multi_reduction <add>, %12, %cst_9 [1] : vector<8x128xf32> to vector<8xf32>
    %14 = vector.shape_cast %13 : vector<8xf32> to vector<8x1xf32>
    %cst_10 = arith.constant 3.125000e-02 : f32
    %15 = vector.broadcast %cst_10 : f32 to vector<8x1xf32>
    %16 = arith.mulf %14, %15 : vector<8x1xf32>
    %17 = arith.mulf %11, %11 : vector<8x1xf32>
    %18 = arith.subf %16, %17 : vector<8x1xf32>
    %cst_11 = arith.constant 0.000000e+00 : f32
    %19 = vector.broadcast %cst_11 : f32 to vector<8x1xf32>
    %20 = arith.maximumf %18, %19 : vector<8x1xf32>
    %21 = vector.broadcast %11 : vector<8x1xf32> to vector<8x128xf32>
    %22 = arith.subf %5, %21 : vector<8x128xf32>
    %cst_12 = arith.constant 9.99999974E-6 : f32
    %23 = vector.broadcast %cst_12 : f32 to vector<8x1xf32>
    %24 = arith.addf %20, %23 : vector<8x1xf32>
    %25 = math.rsqrt %24 : vector<8x1xf32>
    %26 = vector.broadcast %25 : vector<8x1xf32> to vector<8x128xf32>
    %27 = arith.mulf %22, %26 : vector<8x128xf32>
    %28 = vector.broadcast %6 : vector<1x128xf32> to vector<8x128xf32>
    %29 = arith.mulf %27, %28 : vector<8x128xf32>
    %30 = vector.broadcast %7 : vector<1x128xf32> to vector<8x128xf32>
    %31 = arith.addf %29, %30 : vector<8x128xf32>
    %cst_13 = arith.constant 0.000000e+00 : f32
    %32 = vector.broadcast %cst_13 : f32 to vector<8x128xf32>
    %33 = arith.maximumf %31, %32 : vector<8x128xf32>
    %c0_14 = arith.constant 0 : index
    %c0_15 = arith.constant 0 : index
    %34 = vector.load %arg3[%c0_14, %c0_15] : memref<128x128xf32, #tpu.memory_space<vmem>>, vector<128x128xf32>
    %cst_16 = arith.constant dense<0.000000e+00> : vector<8x128xf32>
    %35 = tpu.matmul %33, %34, %cst_16 {dimension_numbers = #tpu.dot_dimension_numbers<[1], [0], [0], [1], [0, 0, 1, 1], [], []>} : vector<8x128xf32>, vector<128x128xf32>, vector<8x128xf32> -> vector<8x128xf32>
    %c3 = arith.constant 3 : index
    %c0_17 = arith.constant 0 : index
    %36 = vector.load %arg4[%c3, %c0_17] : memref<8x128xf32, #tpu.memory_space<vmem>>, vector<1x128xf32>
    %37 = vector.broadcast %36 : vector<1x128xf32> to vector<8x128xf32>
    %38 = arith.addf %35, %37 : vector<8x128xf32>
    %c4 = arith.constant 4 : index
    %c0_18 = arith.constant 0 : index
    %39 = vector.load %arg4[%c4, %c0_18] : memref<8x128xf32, #tpu.memory_space<vmem>>, vector<1x128xf32>
    %c5 = arith.constant 5 : index
    %c0_19 = arith.constant 0 : index
    %40 = vector.load %arg4[%c5, %c0_19] : memref<8x128xf32, #tpu.memory_space<vmem>>, vector<1x128xf32>
    %cst_20 = arith.constant dense<0.000000e+00> : vector<8xf32>
    %41 = vector.multi_reduction <add>, %38, %cst_20 [1] : vector<8x128xf32> to vector<8xf32>
    %42 = vector.shape_cast %41 : vector<8xf32> to vector<8x1xf32>
    %cst_21 = arith.constant 3.125000e-02 : f32
    %43 = vector.broadcast %cst_21 : f32 to vector<8x1xf32>
    %44 = arith.mulf %42, %43 : vector<8x1xf32>
    %45 = arith.mulf %38, %38 : vector<8x128xf32>
    %cst_22 = arith.constant dense<0.000000e+00> : vector<8xf32>
    %46 = vector.multi_reduction <add>, %45, %cst_22 [1] : vector<8x128xf32> to vector<8xf32>
    %47 = vector.shape_cast %46 : vector<8xf32> to vector<8x1xf32>
    %cst_23 = arith.constant 3.125000e-02 : f32
    %48 = vector.broadcast %cst_23 : f32 to vector<8x1xf32>
    %49 = arith.mulf %47, %48 : vector<8x1xf32>
    %50 = arith.mulf %44, %44 : vector<8x1xf32>
    %51 = arith.subf %49, %50 : vector<8x1xf32>
    %cst_24 = arith.constant 0.000000e+00 : f32
    %52 = vector.broadcast %cst_24 : f32 to vector<8x1xf32>
    %53 = arith.maximumf %51, %52 : vector<8x1xf32>
    %54 = vector.broadcast %44 : vector<8x1xf32> to vector<8x128xf32>
    %55 = arith.subf %38, %54 : vector<8x128xf32>
    %cst_25 = arith.constant 9.99999974E-6 : f32
    %56 = vector.broadcast %cst_25 : f32 to vector<8x1xf32>
    %57 = arith.addf %53, %56 : vector<8x1xf32>
    %58 = math.rsqrt %57 : vector<8x1xf32>
    %59 = vector.broadcast %58 : vector<8x1xf32> to vector<8x128xf32>
    %60 = arith.mulf %55, %59 : vector<8x128xf32>
    %61 = vector.broadcast %39 : vector<1x128xf32> to vector<8x128xf32>
    %62 = arith.mulf %60, %61 : vector<8x128xf32>
    %63 = vector.broadcast %40 : vector<1x128xf32> to vector<8x128xf32>
    %64 = arith.addf %62, %63 : vector<8x128xf32>
    %c0_26 = arith.constant 0 : index
    %c0_27 = arith.constant 0 : index
    %65 = vector.load %arg1[%c0_26, %c0_27] : memref<8x128xf32, #tpu.memory_space<vmem>>, vector<8x128xf32>
    %66 = arith.addf %65, %64 : vector<8x128xf32>
    %cst_28 = arith.constant 0.000000e+00 : f32
    %67 = vector.broadcast %cst_28 : f32 to vector<8x128xf32>
    %68 = arith.maximumf %66, %67 : vector<8x128xf32>
    %c0_29 = arith.constant 0 : index
    %c0_30 = arith.constant 0 : index
    %69 = vector.load %arg5[%c0_29, %c0_30] : memref<8x128xf32, #tpu.memory_space<vmem>>, vector<8x128xf32>
    tpu.vector_store %arg5[%c0_29, %c0_30], %68 {strides = array<i32>} : memref<8x128xf32, #tpu.memory_space<vmem>>, vector<8x128xf32>,
    return
  }
  func.func @transform_0(%arg0: i32) -> (i32, i32) {
    %c0_i32 = arith.constant 0 : i32
    %c0_i32_0 = arith.constant 0 : i32
    return %arg0, %c0_i32 : i32, i32
  }
  func.func @transform_1(%arg0: i32) -> (i32, i32) {
    %c0_i32 = arith.constant 0 : i32
    %c0_i32_0 = arith.constant 0 : i32
    %c0_i32_1 = arith.constant 0 : i32
    return %c0_i32, %c0_i32_0 : i32, i32
  }
  func.func @transform_2(%arg0: i32) -> (i32, i32) {
    %c0_i32 = arith.constant 0 : i32
    %c0_i32_0 = arith.constant 0 : i32
    %c0_i32_1 = arith.constant 0 : i32
    return %c0_i32, %c0_i32_0 : i32, i32
  }
  func.func @transform_3(%arg0: i32) -> (i32, i32) {
    %c0_i32 = arith.constant 0 : i32
    %c0_i32_0 = arith.constant 0 : i32
    %c0_i32_1 = arith.constant 0 : i32
    return %c0_i32, %c0_i32_0 : i32, i32
  }
  func.func @transform_4(%arg0: i32) -> (i32, i32) {
    %c0_i32 = arith.constant 0 : i32
    %c0_i32_0 = arith.constant 0 : i32
    return %arg0, %c0_i32 : i32, i32
  }
}

</mosaic_0001>

<bundles_post_ra>
// kernel: tpu_custom_call.1
= control target key start
LH: loop header
LB: loop body
LE: loop exit
PB: predicated region body
PF: predicated region fallthrough
CT: control target
= control target key end

     0   :  { %9 = vsyncpa [#allocation3], 0  ;;  %s649_s0 = inlined_call_operand.hbm [shape: f32[8,128], index: 0, kind: input, shape index: {}]   ;;  %s650_s1 = inlined_call_operand.hbm [shape: f32[128,128], index: 1, kind: input, shape index: {}]   ;;  %s651_s2 = inlined_call_operand.hbm [shape: f32[128,128], index: 2, kind: input, shape index: {}]   ;;  %s652_s3 = inlined_call_operand.hbm [shape: f32[8,128], index: 3, kind: input, shape index: {}]   ;;  %s653_s4 = inlined_call_operand.hbm [shape: f32[8,128], index: 4, kind: output, shape index: {}]  }
   0x1   :  { %10 = vsyncpa [#allocation6], 0 }
   0x2   :  { %11 = vsyncpa [#allocation9], 0 }
   0x3   :  { %12 = vsyncpa [#allocation4], 0  ;;  %s556_s15 = smov [#allocation5]  }
   0x4   :  { %s28_s16 = sshll.u32 %s556_s15, 4  ;;  %s29_s16 = int_to_ptr.vmem [resolvable:$true] %s28_s16 }
   0x5   :  { %s456_s17 = scalar_lea.vmem %s29_s16, 2048  ;;  %p461_p1 = scmp.lt.s32.totalorder %s29_s16, %s29_s16 }
   0x6   :  { %p457_p0 = scmp.ne.s32.totalorder %s29_s16, %s456_s17  ;;  %p462_p2 = scmp.lt.s32.totalorder %s456_s17, %s456_s17 }
   0x8   :  { %p463_p3 = por %p462_p2, %p461_p1 }
   0xa   :  { %p464_p4 = pnand %p463_p3, %p457_p0 }
   0xc   :  { %467 = shalt.err (!%p464_p4)
}
   0xd   :  { %s557_s18 = smov 128   ;;  %s558_s19 = smov 8  }
   0xe   :  { %34 = dma.hbm_to_vmem [thread:$0]  %s650_s1, 2048, %s29_s16, [#allocation6], %s557_s18, %s557_s18, %s558_s19  }
   0xf   :  { %s559_s22 = smov [#allocation2]   ;;  %s560_s24 = smov [#allocation7]  }
  0x10   :  { %s19_s23 = sshll.u32 %s559_s22, 4  ;;  %s40_s25 = sshll.u32 %s560_s24, 4  ;;  %s20_s23 = int_to_ptr.vmem [resolvable:$true] %s19_s23  ;;  %s41_s25 = int_to_ptr.vmem [resolvable:$true] %s40_s25 }
  0x11   :  { %s476_s26 = scalar_lea.vmem %s20_s23, 128  ;;  %p481_p6 = scmp.lt.s32.totalorder %s20_s23, %s20_s23 }
  0x12   :  { %p477_p5 = scmp.ne.s32.totalorder %s20_s23, %s476_s26  ;;  %p482_p7 = scmp.lt.s32.totalorder %s476_s26, %s476_s26 }
  0x14   :  { %p483_p8 = por %p482_p7, %p481_p6 }
  0x16   :  { %p484_p9 = pnand %p483_p8, %p477_p5 }
  0x18   :  { %487 = shalt.err (!%p484_p9)
}
  0x19   :  { %22 = dma.hbm_to_vmem [thread:$0]  %s649_s0, 128, %s20_s23, [#allocation3]  }
  0x1a   :  { %s496_s29 = scalar_lea.vmem %s41_s25, 2048  ;;  %p501_p11 = scmp.lt.s32.totalorder %s41_s25, %s41_s25 }
  0x1b   :  { %p497_p10 = scmp.ne.s32.totalorder %s41_s25, %s496_s29  ;;  %p502_p12 = scmp.lt.s32.totalorder %s496_s29, %s496_s29 }
  0x1d   :  { %p503_p13 = por %p502_p12, %p501_p11 }
  0x1f   :  { %p504_p0 = pnand %p503_p13, %p497_p10 }
  0x21   :  { %507 = shalt.err (!%p504_p0)
}
  0x22   :  { %46 = dma.hbm_to_vmem [thread:$0]  %s651_s2, 2048, %s41_s25, [#allocation6], %s557_s18, %s557_s18, %s558_s19  }
  0x23   :  { %s561_s5 = smov [#allocation8]  }
  0x24   :  { %s53_s6 = sshll.u32 %s561_s5, 4  ;;  %s54_s6 = int_to_ptr.vmem [resolvable:$true] %s53_s6 }
  0x25   :  { %s516_s7 = scalar_lea.vmem %s54_s6, 128  ;;  %p521_p2 = scmp.lt.s32.totalorder %s54_s6, %s54_s6 }
  0x26   :  { %p517_p1 = scmp.ne.s32.totalorder %s54_s6, %s516_s7  ;;  %p522_p3 = scmp.lt.s32.totalorder %s516_s7, %s516_s7 }
  0x28   :  { %p523_p4 = por %p522_p3, %p521_p2 }
  0x2a   :  { %p524_p5 = pnand %p523_p4, %p517_p1 }
  0x2c   :  { %527 = shalt.err (!%p524_p5)
}
  0x2d   :  { %56 = dma.hbm_to_vmem [thread:$0]  %s652_s3, 128, %s54_s6, [#allocation9]  }
  0x2e   :  { %548 = dma.done.wait [#allocation3], 128  }
  0x2f   :  { %549 = vsyncadd [#allocation3], 4294967168 }
  0x30   :  { %550 = dma.done.wait [#allocation6], 4096  }
  0x31   :  { %551 = vsyncadd [#allocation6], 4294963200 }
  0x32   :  { %552 = dma.done.wait [#allocation9], 128  }
  0x33   :  { %553 = vsyncadd [#allocation9], 4294967168  ;;  %v562_v0 = vmov 0.0   ;;  %vm563_vm0 = vmmov 0   ;;  %v85_v1 = vld [vmem:[#allocation5 + $0x78] sm:$0xff]  ;;  %v84_v2 = vld [vmem:[#allocation5 + $0x70] sm:$0xff] }
  0x34   :  { %365 = vmatprep.subr.mxu0 %v562_v0  ;;  %397 = vmatprep.mubr.msk.f32.mxu0 %vm563_vm0, %v562_v0  ;;  %v83_v3 = vld [vmem:[#allocation5 + $0x68] sm:$0xff]  ;;  %v82_v4 = vld [vmem:[#allocation5 + $0x60] sm:$0xff]  ;;  %v81_v5 = vld [vmem:[#allocation5 + $0x58] sm:$0xff]  ;;  %s564_s2 = smov [#allocation10]  }
  0x35   :  { %400 = vmatprep.subr.mxu1 %v562_v0  ;;  %432 = vmatprep.mubr.msk.f32.mxu1 %vm563_vm0, %v562_v0  ;;  %v80_v6 = vld [vmem:[#allocation5 + $0x50] sm:$0xff]  ;;  %v79_v7 = vld [vmem:[#allocation5 + $0x48] sm:$0xff]  ;;  %v78_v8 = vld [vmem:[#allocation5 + $0x40] sm:$0xff]  ;;  %s314_s3 = sshll.u32 %s564_s2, 4  ;;  %s315_s3 = int_to_ptr.vmem [resolvable:$true] %s314_s3 }
  0x36   :  { %366 = vmatpush3.msra.mxu0 %v85_v1  ;;  %v77_v9 = vld [vmem:[#allocation5 + $0x38] sm:$0xff]  ;;  %v76_v10 = vld [vmem:[#allocation5 + $0x30] sm:$0xff]  ;;  %v75_v11 = vld [vmem:[#allocation5 + $0x28] sm:$0xff]  ;;  %s528_s9 = scalar_lea.vmem %s315_s3, 128  ;;  %p533_p7 = scmp.lt.s32.totalorder %s315_s3, %s315_s3 }
  0x37   :  { %367 = vmatprep.subr.mxu0 %v562_v0  ;;  %v74_v12 = vld [vmem:[#allocation5 + $0x20] sm:$0xff]  ;;  %v73_v13 = vld [vmem:[#allocation5 + $0x18] sm:$0xff]  ;;  %v72_v14 = vld [vmem:[#allocation5 + $0x10] sm:$0xff]  ;;  %p529_p6 = scmp.ne.s32.totalorder %s315_s3, %s528_s9  ;;  %p534_p8 = scmp.lt.s32.totalorder %s528_s9, %s528_s9 }
  0x38   :  { %368 = vmatpush3.msra.mxu0 %v84_v2  ;;  %v71_v15 = vld [vmem:[#allocation5 + $0x8] sm:$0xff]  ;;  %v70_v16 = vld [vmem:[#allocation5] sm:$0xff]  ;;  %v620_v17 = vld [vmem:[#allocation2] sm:$0xff] }
  0x39   :  { %369 = vmatprep.subr.mxu0 %v562_v0  ;;  %v325_v18 = vld [vmem:[#allocation8] ss:$0 sm:$0xff]  ;;  %v203_v23 = vld [vmem:[#allocation7 + $0x78] sm:$0xff]  ;;  %v202_v24 = vld [vmem:[#allocation7 + $0x70] sm:$0xff]  ;;  %p535_p9 = por %p534_p8, %p533_p7 }
  0x3a   :  { %370 = vmatpush3.msra.mxu0 %v83_v3  ;;  %401 = vmatpush3.msra.mxu1 %v203_v23  ;;  %v201_v25 = vld [vmem:[#allocation7 + $0x68] sm:$0xff]  ;;  %v200_v26 = vld [vmem:[#allocation7 + $0x60] sm:$0xff]  ;;  %v199_v27 = vld [vmem:[#allocation7 + $0x58] sm:$0xff] }
  0x3b   :  { %371 = vmatprep.subr.mxu0 %v562_v0  ;;  %402 = vmatprep.subr.mxu1 %v562_v0  ;;  %v198_v28 = vld [vmem:[#allocation7 + $0x50] sm:$0xff]  ;;  %v197_v29 = vld [vmem:[#allocation7 + $0x48] sm:$0xff]  ;;  %v196_v30 = vld [vmem:[#allocation7 + $0x40] sm:$0xff]  ;;  %p536_p10 = pnand %p535_p9, %p529_p6 }
  0x3c   :  { %372 = vmatpush3.msra.mxu0 %v82_v4  ;;  %403 = vmatpush3.msra.mxu1 %v202_v24  ;;  %v195_v31 = vld [vmem:[#allocation7 + $0x38] sm:$0xff]  ;;  %v194_v32 = vld [vmem:[#allocation7 + $0x30] sm:$0xff]  ;;  %v193_v33 = vld [vmem:[#allocation7 + $0x28] sm:$0xff] }
  0x3d   :  { %373 = vmatprep.subr.mxu0 %v562_v0  ;;  %404 = vmatprep.subr.mxu1 %v562_v0  ;;  %v192_v34 = vld [vmem:[#allocation7 + $0x20] sm:$0xff]  ;;  %v191_v35 = vld [vmem:[#allocation7 + $0x18] sm:$0xff]  ;;  %v190_v36 = vld [vmem:[#allocation7 + $0x10] sm:$0xff] }
  0x3e   :  { %374 = vmatpush3.msra.mxu0 %v81_v5  ;;  %405 = vmatpush3.msra.mxu1 %v201_v25  ;;  %v189_v37 = vld [vmem:[#allocation7 + $0x8] sm:$0xff]  ;;  %v188_v38 = vld [vmem:[#allocation7] sm:$0xff] }
  0x3f   :  { %375 = vmatprep.subr.mxu0 %v562_v0  ;;  %406 = vmatprep.subr.mxu1 %v562_v0  ;;  %v326_v49 = vld [vmem:[#allocation8 + $0x1] ss:$0 sm:$0xff]  ;;  %v327_v51 = vld [vmem:[#allocation8 + $0x2] ss:$0 sm:$0xff]  ;;  %v328_v55 = vld [vmem:[#allocation8 + $0x3] ss:$0 sm:$0xff] }
  0x40   :  { %376 = vmatpush3.msra.mxu0 %v80_v6  ;;  %407 = vmatpush3.msra.mxu1 %v200_v26  ;;  %v329_v6 = vld [vmem:[#allocation8 + $0x4] ss:$0 sm:$0xff] }
  0x41   :  { %377 = vmatprep.subr.mxu0 %v562_v0  ;;  %408 = vmatprep.subr.mxu1 %v562_v0 }
  0x42   :  { %378 = vmatpush3.msra.mxu0 %v79_v7  ;;  %409 = vmatpush3.msra.mxu1 %v199_v27 }
  0x43   :  { %379 = vmatprep.subr.mxu0 %v562_v0  ;;  %410 = vmatprep.subr.mxu1 %v562_v0 }
  0x44   :  { %380 = vmatpush3.msra.mxu0 %v78_v8  ;;  %411 = vmatpush3.msra.mxu1 %v198_v28  ;;  %v330_v8 = vld [vmem:[#allocation8 + $0x5] ss:$0 sm:$0xff] }
  0x45   :  { %381 = vmatprep.subr.mxu0 %v562_v0  ;;  %412 = vmatprep.subr.mxu1 %v562_v0 }
  0x46   :  { %382 = vmatpush3.msra.mxu0 %v77_v9  ;;  %413 = vmatpush3.msra.mxu1 %v197_v29 }
  0x47   :  { %383 = vmatprep.subr.mxu0 %v562_v0  ;;  %414 = vmatprep.subr.mxu1 %v562_v0 }
  0x48   :  { %384 = vmatpush3.msra.mxu0 %v76_v10  ;;  %415 = vmatpush3.msra.mxu1 %v196_v30 }
  0x49   :  { %385 = vmatprep.subr.mxu0 %v562_v0  ;;  %416 = vmatprep.subr.mxu1 %v562_v0 }
  0x4a   :  { %386 = vmatpush3.msra.mxu0 %v75_v11  ;;  %417 = vmatpush3.msra.mxu1 %v195_v31 }
  0x4b   :  { %387 = vmatprep.subr.mxu0 %v562_v0  ;;  %418 = vmatprep.subr.mxu1 %v562_v0 }
  0x4c   :  { %388 = vmatpush3.msra.mxu0 %v74_v12  ;;  %419 = vmatpush3.msra.mxu1 %v194_v32 }
  0x4d   :  { %389 = vmatprep.subr.mxu0 %v562_v0  ;;  %420 = vmatprep.subr.mxu1 %v562_v0 }
  0x4e   :  { %390 = vmatpush3.msra.mxu0 %v73_v13  ;;  %421 = vmatpush3.msra.mxu1 %v193_v33 }
  0x4f   :  { %391 = vmatprep.subr.mxu0 %v562_v0  ;;  %422 = vmatprep.subr.mxu1 %v562_v0 }
  0x50   :  { %392 = vmatpush3.msra.mxu0 %v72_v14  ;;  %423 = vmatpush3.msra.mxu1 %v192_v34 }
  0x51   :  { %393 = vmatprep.subr.mxu0 %v562_v0  ;;  %424 = vmatprep.subr.mxu1 %v562_v0 }
  0x52   :  { %394 = vmatpush3.msra.mxu0 %v71_v15  ;;  %425 = vmatpush3.msra.mxu1 %v191_v35 }
  0x53   :  { %395 = vmatprep.subr.mxu0 %v562_v0  ;;  %426 = vmatprep.subr.mxu1 %v562_v0 }
  0x54   :  { %396 = vmatpush3.msra.mxu0 %v70_v16  ;;  %427 = vmatpush3.msra.mxu1 %v190_v36 }
  0x55   :  { %398 = vmatmul.mubr.f32.vlgmr.msra.gmra.mxu0 %v620_v17  ;;  %428 = vmatprep.subr.mxu1 %v562_v0 }
  0x56   :  { %429 = vmatpush3.msra.mxu1 %v189_v37 }
  0x57   :  { %430 = vmatprep.subr.mxu1 %v562_v0 }
  0x58   :  { %431 = vmatpush3.msra.mxu1 %v188_v38 }
 0x115   :  { %v157_v19 = vpop.f32.mrf.mxu0 }
 0x116   :  { %v624_v20 = vadd.f32 %v325_v18, %v157_v19 }
 0x117   :  { %v399_v21 = vpop.f32.mrf.mxu0 }
 0x118   :  { %163 = vadd.xlane.f32.xlu0 %v624_v20  ;;  %v166_v22 = vmul.f32 %v624_v20, %v624_v20 }
 0x11c   :  { %167 = vadd.xlane.f32.xlu0 %v166_v22 }
 0x1a1   :  { %v164_v39 = vpop.xlane.xlu0 %163 }
 0x1a2   :  { %v165_v40 = vmul.f32 0.03125, %v164_v39 }
 0x1a4   :  { %v170_v42 = vmul.f32 %v165_v40, %v165_v40  ;;  %v173_v47 = vsub.f32 %v624_v20, %v165_v40 }
 0x1a5   :  { %v168_v41 = vpop.xlane.xlu0 %167 }
 0x1a6   :  { %v169_v43 = vmul.f32 0.03125, %v168_v41 }
 0x1a8   :  { %v171_v44 = vsub.f32 %v169_v43, %v170_v42 }
 0x1aa   :  { %v172_v45 = vmax.f32 %v171_v44, 0.0 }
 0x1ac   :  { %v174_v46 = vadd.f32 1e-05, %v172_v45 }
 0x1ae   :  { %444 = vrsqrt.f32 %v174_v46 }
 0x1bb   :  { %v445_v48 = vpop.eup %444 }
 0x1bc   :  { %v176_v50 = vmul.f32 %v445_v48, %v173_v47 }
 0x1be   :  { %v181_v52 = vmul.f32 %v326_v49, %v176_v50 }
 0x1c0   :  { %v186_v53 = vadd.f32 %v327_v51, %v181_v52 }
 0x1c2   :  { %v187_v54 = vmax.f32 %v186_v53, 0.0 }
 0x1c4   :  { %433 = vmatmul.mubr.f32.vlgmr.msra.gmra.mxu1 %v187_v54 }
 0x284   :  { %v275_v56 = vpop.f32.mrf.mxu1 }
 0x285   :  { %v276_v57 = vadd.f32 %v328_v55, %v275_v56 }
 0x286   :  { %v434_v58 = vpop.f32.mrf.mxu1 }
 0x287   :  { %281 = vadd.xlane.f32.xlu1 %v276_v57  ;;  %v284_v59 = vmul.f32 %v276_v57, %v276_v57 }
 0x28b   :  { %285 = vadd.xlane.f32.xlu1 %v284_v59 }
 0x310   :  { %v282_v60 = vpop.xlane.xlu1 %281 }
 0x311   :  { %v283_v61 = vmul.f32 0.03125, %v282_v60 }
 0x313   :  { %v288_v63 = vmul.f32 %v283_v61, %v283_v61  ;;  %v291_v4 = vsub.f32 %v276_v57, %v283_v61 }
 0x314   :  { %v286_v62 = vpop.xlane.xlu1 %285 }
 0x315   :  { %v287_v0 = vmul.f32 0.03125, %v286_v62 }
 0x317   :  { %v289_v1 = vsub.f32 %v287_v0, %v288_v63 }
 0x319   :  { %v290_v2 = vmax.f32 %v289_v1, 0.0 }
 0x31b   :  { %v292_v3 = vadd.f32 1e-05, %v290_v2 }
 0x31d   :  { %446 = vrsqrt.f32 %v292_v3 }
 0x32a   :  { %v447_v5 = vpop.eup %446 }
 0x32b   :  { %v294_v7 = vmul.f32 %v447_v5, %v291_v4 }
 0x32d   :  { %v299_v9 = vmul.f32 %v329_v6, %v294_v7 }
 0x32f   :  { %v304_v10 = vadd.f32 %v330_v8, %v299_v9 }
 0x331   :  { %v305_v11 = vadd.f32 %v304_v10, %v620_v17 }
 0x333   :  { %v306_v12 = vmax.f32 %v305_v11, 0.0 }
 0x335   :  { %307 = vst [vmem:[#allocation10] sm:$0xff] %v306_v12 }
 0x336   :  { %539 = shalt.err (!%p536_p10)
}
 0x337   :  { %317 = dma.vmem_to_hbm [thread:$0]  %s315_s3, 128, %s653_s4, [#allocation4]  }
 0x338   :  { %554 = dma.done.wait [#allocation4], 128  }
 0x339   :  { %555 = vsyncadd [#allocation4], 4294967168 }
 0x33a   :  { %321 = vsyncpa [#allocation3], 1 }
 0x33b   :  { %322 = vsyncpa [#allocation6], 1 }
 0x33c   :  { %323 = vsyncpa [#allocation9], 1 }
 0x33d   :  { %324 = vsyncpa [#allocation4], 1 }

// kernel: tpu_custom_call.1
= control target key start
LH: loop header
LB: loop body
LE: loop exit
PB: predicated region body
PF: predicated region fallthrough
CT: control target
= control target key end

     0   :  { %9 = vsyncpa [#allocation3], 0  ;;  %s649_s0 = inlined_call_operand.hbm [shape: f32[8,128], index: 0, kind: input, shape index: {}]   ;;  %s650_s1 = inlined_call_operand.hbm [shape: f32[128,128], index: 1, kind: input, shape index: {}]   ;;  %s651_s2 = inlined_call_operand.hbm [shape: f32[128,128], index: 2, kind: input, shape index: {}]   ;;  %s652_s3 = inlined_call_operand.hbm [shape: f32[8,128], index: 3, kind: input, shape index: {}]   ;;  %s653_s4 = inlined_call_operand.hbm [shape: f32[8,128], index: 4, kind: output, shape index: {}]  }
   0x1   :  { %10 = vsyncpa [#allocation6], 0 }
   0x2   :  { %11 = vsyncpa [#allocation9], 0 }
   0x3   :  { %12 = vsyncpa [#allocation4], 0  ;;  %s556_s15 = smov [#allocation5]  }
   0x4   :  { %s28_s16 = sshll.u32 %s556_s15, 4  ;;  %s29_s16 = int_to_ptr.vmem [resolvable:$true] %s28_s16 }
   0x5   :  { %s456_s17 = scalar_lea.vmem %s29_s16, 2048  ;;  %p461_p1 = scmp.lt.s32.totalorder %s29_s16, %s29_s16 }
   0x6   :  { %p457_p0 = scmp.ne.s32.totalorder %s29_s16, %s456_s17  ;;  %p462_p2 = scmp.lt.s32.totalorder %s456_s17, %s456_s17 }
   0x8   :  { %p463_p3 = por %p462_p2, %p461_p1 }
   0xa   :  { %p464_p4 = pnand %p463_p3, %p457_p0 }
   0xc   :  { %467 = shalt.err (!%p464_p4)
}
   0xd   :  { %s557_s18 = smov 128   ;;  %s558_s19 = smov 8  }
   0xe   :  { %34 = dma.hbm_to_vmem [thread:$0]  %s650_s1, 2048, %s29_s16, [#allocation6], %s557_s18, %s557_s18, %s558_s19  }
   0xf   :  { %s559_s22 = smov [#allocation2]   ;;  %s560_s24 = smov [#allocation7]  }
  0x10   :  { %s19_s23 = sshll.u32 %s559_s22, 4  ;;  %s40_s25 = sshll.u32 %s560_s24, 4  ;;  %s20_s23 = int_to_ptr.vmem [resolvable:$true] %s19_s23  ;;  %s41_s25 = int_to_ptr.vmem [resolvable:$true] %s40_s25 }
  0x11   :  { %s476_s26 = scalar_lea.vmem %s20_s23, 128  ;;  %p481_p6 = scmp.lt.s32.totalorder %s20_s23, %s20_s23 }
  0x12   :  { %p477_p5 = scmp.ne.s32.totalorder %s20_s23, %s476_s26  ;;  %p482_p7 = scmp.lt.s32.totalorder %s476_s26, %s476_s26 }
  0x14   :  { %p483_p8 = por %p482_p7, %p481_p6 }
  0x16   :  { %p484_p9 = pnand %p483_p8, %p477_p5 }
  0x18   :  { %487 = shalt.err (!%p484_p9)
}
  0x19   :  { %22 = dma.hbm_to_vmem [thread:$0]  %s649_s0, 128, %s20_s23, [#allocation3]  }
  0x1a   :  { %s496_s29 = scalar_lea.vmem %s41_s25, 2048  ;;  %p501_p11 = scmp.lt.s32.totalorder %s41_s25, %s41_s25 }
  0x1b   :  { %p497_p10 = scmp.ne.s32.totalorder %s41_s25, %s496_s29  ;;  %p502_p12 = scmp.lt.s32.totalorder %s496_s29, %s496_s29 }
  0x1d   :  { %p503_p13 = por %p502_p12, %p501_p11 }
  0x1f   :  { %p504_p0 = pnand %p503_p13, %p497_p10 }
  0x21   :  { %507 = shalt.err (!%p504_p0)
}
  0x22   :  { %46 = dma.hbm_to_vmem [thread:$0]  %s651_s2, 2048, %s41_s25, [#allocation6], %s557_s18, %s557_s18, %s558_s19  }
  0x23   :  { %s561_s5 = smov [#allocation8]  }
  0x24   :  { %s53_s6 = sshll.u32 %s561_s5, 4  ;;  %s54_s6 = int_to_ptr.vmem [resolvable:$true] %s53_s6 }
  0x25   :  { %s516_s7 = scalar_lea.vmem %s54_s6, 128  ;;  %p521_p2 = scmp.lt.s32.totalorder %s54_s6, %s54_s6 }
  0x26   :  { %p517_p1 = scmp.ne.s32.totalorder %s54_s6, %s516_s7  ;;  %p522_p3 = scmp.lt.s32.totalorder %s516_s7, %s516_s7 }
  0x28   :  { %p523_p4 = por %p522_p3, %p521_p2 }
  0x2a   :  { %p524_p5 = pnand %p523_p4, %p517_p1 }
  0x2c   :  { %527 = shalt.err (!%p524_p5)
}
  0x2d   :  { %56 = dma.hbm_to_vmem [thread:$0]  %s652_s3, 128, %s54_s6, [#allocation9]  }
  0x2e   :  { %548 = dma.done.wait [#allocation3], 128  }
  0x2f   :  { %549 = vsyncadd [#allocation3], 4294967168 }
  0x30   :  { %550 = dma.done.wait [#allocation6], 4096  }
  0x31   :  { %551 = vsyncadd [#allocation6], 4294963200 }
  0x32   :  { %552 = dma.done.wait [#allocation9], 128  }
  0x33   :  { %553 = vsyncadd [#allocation9], 4294967168  ;;  %v562_v0 = vmov 0.0   ;;  %vm563_vm0 = vmmov 0   ;;  %v85_v1 = vld [vmem:[#allocation5 + $0x78] sm:$0xff]  ;;  %v84_v2 = vld [vmem:[#allocation5 + $0x70] sm:$0xff] }
  0x34   :  { %365 = vmatprep.subr.mxu0 %v562_v0  ;;  %397 = vmatprep.mubr.msk.f32.mxu0 %vm563_vm0, %v562_v0  ;;  %v83_v3 = vld [vmem:[#allocation5 + $0x68] sm:$0xff]  ;;  %v82_v4 = vld [vmem:[#allocation5 + $0x60] sm:$0xff]  ;;  %v81_v5 = vld [vmem:[#allocation5 + $0x58] sm:$0xff]  ;;  %s564_s2 = smov [#allocation10]  }
  0x35   :  { %400 = vmatprep.subr.mxu1 %v562_v0  ;;  %432 = vmatprep.mubr.msk.f32.mxu1 %vm563_vm0, %v562_v0  ;;  %v80_v6 = vld [vmem:[#allocation5 + $0x50] sm:$0xff]  ;;  %v79_v7 = vld [vmem:[#allocation5 + $0x48] sm:$0xff]  ;;  %v78_v8 = vld [vmem:[#allocation5 + $0x40] sm:$0xff]  ;;  %s314_s3 = sshll.u32 %s564_s2, 4  ;;  %s315_s3 = int_to_ptr.vmem [resolvable:$true] %s314_s3 }
  0x36   :  { %366 = vmatpush3.msra.mxu0 %v85_v1  ;;  %v77_v9 = vld [vmem:[#allocation5 + $0x38] sm:$0xff]  ;;  %v76_v10 = vld [vmem:[#allocation5 + $0x30] sm:$0xff]  ;;  %v75_v11 = vld [vmem:[#allocation5 + $0x28] sm:$0xff]  ;;  %s528_s9 = scalar_lea.vmem %s315_s3, 128  ;;  %p533_p7 = scmp.lt.s32.totalorder %s315_s3, %s315_s3 }
  0x37   :  { %367 = vmatprep.subr.mxu0 %v562_v0  ;;  %v74_v12 = vld [vmem:[#allocation5 + $0x20] sm:$0xff]  ;;  %v73_v13 = vld [vmem:[#allocation5 + $0x18] sm:$0xff]  ;;  %v72_v14 = vld [vmem:[#allocation5 + $0x10] sm:$0xff]  ;;  %p529_p6 = scmp.ne.s32.totalorder %s315_s3, %s528_s9  ;;  %p534_p8 = scmp.lt.s32.totalorder %s528_s9, %s528_s9 }
  0x38   :  { %368 = vmatpush3.msra.mxu0 %v84_v2  ;;  %v71_v15 = vld [vmem:[#allocation5 + $0x8] sm:$0xff]  ;;  %v70_v16 = vld [vmem:[#allocation5] sm:$0xff]  ;;  %v620_v17 = vld [vmem:[#allocation2] sm:$0xff] }
  0x39   :  { %369 = vmatprep.subr.mxu0 %v562_v0  ;;  %v325_v18 = vld [vmem:[#allocation8] ss:$0 sm:$0xff]  ;;  %v203_v23 = vld [vmem:[#allocation7 + $0x78] sm:$0xff]  ;;  %v202_v24 = vld [vmem:[#allocation7 + $0x70] sm:$0xff]  ;;  %p535_p9 = por %p534_p8, %p533_p7 }
  0x3a   :  { %370 = vmatpush3.msra.mxu0 %v83_v3  ;;  %401 = vmatpush3.msra.mxu1 %v203_v23  ;;  %v201_v25 = vld [vmem:[#allocation7 + $0x68] sm:$0xff]  ;;  %v200_v26 = vld [vmem:[#allocation7 + $0x60] sm:$0xff]  ;;  %v199_v27 = vld [vmem:[#allocation7 + $0x58] sm:$0xff] }
  0x3b   :  { %371 = vmatprep.subr.mxu0 %v562_v0  ;;  %402 = vmatprep.subr.mxu1 %v562_v0  ;;  %v198_v28 = vld [vmem:[#allocation7 + $0x50] sm:$0xff]  ;;  %v197_v29 = vld [vmem:[#allocation7 + $0x48] sm:$0xff]  ;;  %v196_v30 = vld [vmem:[#allocation7 + $0x40] sm:$0xff]  ;;  %p536_p10 = pnand %p535_p9, %p529_p6 }
  0x3c   :  { %372 = vmatpush3.msra.mxu0 %v82_v4  ;;  %403 = vmatpush3.msra.mxu1 %v202_v24  ;;  %v195_v31 = vld [vmem:[#allocation7 + $0x38] sm:$0xff]  ;;  %v194_v32 = vld [vmem:[#allocation7 + $0x30] sm:$0xff]  ;;  %v193_v33 = vld [vmem:[#allocation7 + $0x28] sm:$0xff] }
  0x3d   :  { %373 = vmatprep.subr.mxu0 %v562_v0  ;;  %404 = vmatprep.subr.mxu1 %v562_v0  ;;  %v192_v34 = vld [vmem:[#allocation7 + $0x20] sm:$0xff]  ;;  %v191_v35 = vld [vmem:[#allocation7 + $0x18] sm:$0xff]  ;;  %v190_v36 = vld [vmem:[#allocation7 + $0x10] sm:$0xff] }
  0x3e   :  { %374 = vmatpush3.msra.mxu0 %v81_v5  ;;  %405 = vmatpush3.msra.mxu1 %v201_v25  ;;  %v189_v37 = vld [vmem:[#allocation7 + $0x8] sm:$0xff]  ;;  %v188_v38 = vld [vmem:[#allocation7] sm:$0xff] }
  0x3f   :  { %375 = vmatprep.subr.mxu0 %v562_v0  ;;  %406 = vmatprep.subr.mxu1 %v562_v0  ;;  %v326_v49 = vld [vmem:[#allocation8 + $0x1] ss:$0 sm:$0xff]  ;;  %v327_v51 = vld [vmem:[#allocation8 + $0x2] ss:$0 sm:$0xff]  ;;  %v328_v55 = vld [vmem:[#allocation8 + $0x3] ss:$0 sm:$0xff] }
  0x40   :  { %376 = vmatpush3.msra.mxu0 %v80_v6  ;;  %407 = vmatpush3.msra.mxu1 %v200_v26  ;;  %v329_v6 = vld [vmem:[#allocation8 + $0x4] ss:$0 sm:$0xff] }
  0x41   :  { %377 = vmatprep.subr.mxu0 %v562_v0  ;;  %408 = vmatprep.subr.mxu1 %v562_v0 }
  0x42   :  { %378 = vmatpush3.msra.mxu0 %v79_v7  ;;  %409 = vmatpush3.msra.mxu1 %v199_v27 }
  0x43   :  { %379 = vmatprep.subr.mxu0 %v562_v0  ;;  %410 = vmatprep.subr.mxu1 %v562_v0 }
  0x44   :  { %380 = vmatpush3.msra.mxu0 %v78_v8  ;;  %411 = vmatpush3.msra.mxu1 %v198_v28  ;;  %v330_v8 = vld [vmem:[#allocation8 + $0x5] ss:$0 sm:$0xff] }
  0x45   :  { %381 = vmatprep.subr.mxu0 %v562_v0  ;;  %412 = vmatprep.subr.mxu1 %v562_v0 }
  0x46   :  { %382 = vmatpush3.msra.mxu0 %v77_v9  ;;  %413 = vmatpush3.msra.mxu1 %v197_v29 }
  0x47   :  { %383 = vmatprep.subr.mxu0 %v562_v0  ;;  %414 = vmatprep.subr.mxu1 %v562_v0 }
  0x48   :  { %384 = vmatpush3.msra.mxu0 %v76_v10  ;;  %415 = vmatpush3.msra.mxu1 %v196_v30 }
  0x49   :  { %385 = vmatprep.subr.mxu0 %v562_v0  ;;  %416 = vmatprep.subr.mxu1 %v562_v0 }
  0x4a   :  { %386 = vmatpush3.msra.mxu0 %v75_v11  ;;  %417 = vmatpush3.msra.mxu1 %v195_v31 }
  0x4b   :  { %387 = vmatprep.subr.mxu0 %v562_v0  ;;  %418 = vmatprep.subr.mxu1 %v562_v0 }
  0x4c   :  { %388 = vmatpush3.msra.mxu0 %v74_v12  ;;  %419 = vmatpush3.msra.mxu1 %v194_v32 }
  0x4d   :  { %389 = vmatprep.subr.mxu0 %v562_v0  ;;  %420 = vmatprep.subr.mxu1 %v562_v0 }
  0x4e   :  { %390 = vmatpush3.msra.mxu0 %v73_v13  ;;  %421 = vmatpush3.msra.mxu1 %v193_v33 }
  0x4f   :  { %391 = vmatprep.subr.mxu0 %v562_v0  ;;  %422 = vmatprep.subr.mxu1 %v562_v0 }
  0x50   :  { %392 = vmatpush3.msra.mxu0 %v72_v14  ;;  %423 = vmatpush3.msra.mxu1 %v192_v34 }
  0x51   :  { %393 = vmatprep.subr.mxu0 %v562_v0  ;;  %424 = vmatprep.subr.mxu1 %v562_v0 }
  0x52   :  { %394 = vmatpush3.msra.mxu0 %v71_v15  ;;  %425 = vmatpush3.msra.mxu1 %v191_v35 }
  0x53   :  { %395 = vmatprep.subr.mxu0 %v562_v0  ;;  %426 = vmatprep.subr.mxu1 %v562_v0 }
  0x54   :  { %396 = vmatpush3.msra.mxu0 %v70_v16  ;;  %427 = vmatpush3.msra.mxu1 %v190_v36 }
  0x55   :  { %398 = vmatmul.mubr.f32.vlgmr.msra.gmra.mxu0 %v620_v17  ;;  %428 = vmatprep.subr.mxu1 %v562_v0 }
  0x56   :  { %429 = vmatpush3.msra.mxu1 %v189_v37 }
  0x57   :  { %430 = vmatprep.subr.mxu1 %v562_v0 }
  0x58   :  { %431 = vmatpush3.msra.mxu1 %v188_v38 }
 0x115   :  { %v157_v19 = vpop.f32.mrf.mxu0 }
 0x116   :  { %v624_v20 = vadd.f32 %v325_v18, %v157_v19 }
 0x117   :  { %v399_v21 = vpop.f32.mrf.mxu0 }
 0x118   :  { %163 = vadd.xlane.f32.xlu0 %v624_v20  ;;  %v166_v22 = vmul.f32 %v624_v20, %v624_v20 }
 0x11c   :  { %167 = vadd.xlane.f32.xlu0 %v166_v22 }
 0x1a1   :  { %v164_v39 = vpop.xlane.xlu0 %163 }
 0x1a2   :  { %v165_v40 = vmul.f32 0.03125, %v164_v39 }
 0x1a4   :  { %v170_v42 = vmul.f32 %v165_v40, %v165_v40  ;;  %v173_v47 = vsub.f32 %v624_v20, %v165_v40 }
 0x1a5   :  { %v168_v41 = vpop.xlane.xlu0 %167 }
 0x1a6   :  { %v169_v43 = vmul.f32 0.03125, %v168_v41 }
 0x1a8   :  { %v171_v44 = vsub.f32 %v169_v43, %v170_v42 }
 0x1aa   :  { %v172_v45 = vmax.f32 %v171_v44, 0.0 }
 0x1ac   :  { %v174_v46 = vadd.f32 1e-05, %v172_v45 }
 0x1ae   :  { %444 = vrsqrt.f32 %v174_v46 }
 0x1bb   :  { %v445_v48 = vpop.eup %444 }
 0x1bc   :  { %v176_v50 = vmul.f32 %v445_v48, %v173_v47 }
 0x1be   :  { %v181_v52 = vmul.f32 %v326_v49, %v176_v50 }
 0x1c0   :  { %v186_v53 = vadd.f32 %v327_v51, %v181_v52 }
 0x1c2   :  { %v187_v54 = vmax.f32 %v186_v53, 0.0 }
 0x1c4   :  { %433 = vmatmul.mubr.f32.vlgmr.msra.gmra.mxu1 %v187_v54 }
 0x284   :  { %v275_v56 = vpop.f32.mrf.mxu1 }
 0x285   :  { %v276_v57 = vadd.f32 %v328_v55, %v275_v56 }
 0x286   :  { %v434_v58 = vpop.f32.mrf.mxu1 }
 0x287   :  { %281 = vadd.xlane.f32.xlu1 %v276_v57  ;;  %v284_v59 = vmul.f32 %v276_v57, %v276_v57 }
 0x28b   :  { %285 = vadd.xlane.f32.xlu1 %v284_v59 }
 0x310   :  { %v282_v60 = vpop.xlane.xlu1 %281 }
 0x311   :  { %v283_v61 = vmul.f32 0.03125, %v282_v60 }
 0x313   :  { %v288_v63 = vmul.f32 %v283_v61, %v283_v61  ;;  %v291_v4 = vsub.f32 %v276_v57, %v283_v61 }
 0x314   :  { %v286_v62 = vpop.xlane.xlu1 %285 }
 0x315   :  { %v287_v0 = vmul.f32 0.03125, %v286_v62 }
 0x317   :  { %v289_v1 = vsub.f32 %v287_v0, %v288_v63 }
 0x319   :  { %v290_v2 = vmax.f32 %v289_v1, 0.0 }
 0x31b   :  { %v292_v3 = vadd.f32 1e-05, %v290_v2 }
 0x31d   :  { %446 = vrsqrt.f32 %v292_v3 }
 0x32a   :  { %v447_v5 = vpop.eup %446 }
 0x32b   :  { %v294_v7 = vmul.f32 %v447_v5, %v291_v4 }
 0x32d   :  { %v299_v9 = vmul.f32 %v329_v6, %v294_v7 }
 0x32f   :  { %v304_v10 = vadd.f32 %v330_v8, %v299_v9 }
 0x331   :  { %v305_v11 = vadd.f32 %v304_v10, %v620_v17 }
 0x333   :  { %v306_v12 = vmax.f32 %v305_v11, 0.0 }
 0x335   :  { %307 = vst [vmem:[#allocation10] sm:$0xff] %v306_v12 }
 0x336   :  { %539 = shalt.err (!%p536_p10)
}
 0x337   :  { %317 = dma.vmem_to_hbm [thread:$0]  %s315_s3, 128, %s653_s4, [#allocation4]  }
 0x338   :  { %554 = dma.done.wait [#allocation4], 128  }
 0x339   :  { %555 = vsyncadd [#allocation4], 4294967168 }
 0x33a   :  { %321 = vsyncpa [#allocation3], 1 }
 0x33b   :  { %322 = vsyncpa [#allocation6], 1 }
 0x33c   :  { %323 = vsyncpa [#allocation9], 1 }
 0x33d   :  { %324 = vsyncpa [#allocation4], 1 }

</bundles_post_ra>
